<compile_context>
chip_gen: v5e
topology: v5e:2x2
jax: 0.10.0
libtpu: 0.0.40
codegen_flags: <defaults>
</compile_context>

<pallas_src>
import functools

import jax
import jax.numpy as jnp
from jax.experimental import pallas as pl
from jax.experimental.pallas import tpu as pltpu

SMOOTH = 1e-5
LANES = 128


def _cdiv(a, b):
    return (a + b - 1) // b


def _round_up(x, m):
    return ((x + m - 1) // m) * m


def _vmem_plan():
    """(vmem_limit_bytes, tile_budget_bytes), safe on v5e/v6e (128 MiB) and v7x (64 MiB/TC)."""
    cap = 64 << 20                                  # conservative default (v7x per-TC)
    try:
        info = pltpu.get_tpu_info()
        c = getattr(info, "vmem_capacity_bytes", None)
        if c:
            cap = int(c)
    except Exception:
        pass
    limit = min((cap * 3) // 4, 48 << 20)           # 24-48 MiB target band everywhere
    tile_budget = max(limit - (8 << 20), 4 << 20)   # headroom for accs + compiler scratch
    return limit, tile_budget


def _choose_ts(g, n_classes, logit_itemsize, tile_budget, sub):
    """Largest sublane tile TS (rows of 128 lanes) fitting the VMEM tile budget."""
    per_row = 2 * LANES * (n_classes * logit_itemsize + 4)   # 2x-buffered logits + labels
    ts = max(sub, tile_budget // per_row)
    if ts >= g:
        return g                                    # one block covers the spatial axis
    return max(sub, (ts // sub) * sub)


def _dice_kernel(x_ref, t_ref, inter_ref, zsum_ref, ysum_ref, *,
                 hw, ts, fs, m_per, apply_softmax, needs_mask):
    # x_ref: (C, TS, 128) logits in native dtype; t_ref: (TS, 128) int32 labels.
    # inter/zsum/ysum_ref: (C, FS, 128) f32 lane/sublane-dense resident accumulators.
    m = pl.program_id(2)

    @pl.when(m == 0)
    def _():
        inter_ref[...] = jnp.zeros_like(inter_ref)
        zsum_ref[...] = jnp.zeros_like(zsum_ref)
        ysum_ref[...] = jnp.zeros_like(ysum_ref)

    x = x_ref[...].astype(jnp.float32)      # cast after DMA; bf16 stays bf16 in HBM
    t = t_ref[...]                          # (TS, 128) int32
    C = x.shape[0]

    if apply_softmax:
        # Class axis is a leading axis: max/sum are elementwise VPU ops across
        # C vreg slabs (no XLU).  Denominator reciprocal runs on the EUP.
        xm = jnp.max(x, axis=0, keepdims=True)
        e = jnp.exp(x - xm)
        p = e * pl.reciprocal(jnp.sum(e, axis=0, keepdims=True), approx=True)
    else:
        p = x

    if needs_mask:
        m_glb = pl.program_id(0) * m_per + m
        row = jax.lax.broadcasted_iota(jnp.int32, (ts, LANES), 0)
        lane = jax.lax.broadcasted_iota(jnp.int32, (ts, LANES), 1)
        valid = ((m_glb * ts + row) * LANES + lane) < hw       # (TS, 128)
        # softmax of padded/garbage columns is ~1/C (or NaN), not 0 -> mask p.
        p = jnp.where(valid, p, 0.0)

    def fold(v):                            # (TS,128) -> (FS,128); VPU adds only
        if fs == ts:
            return v
        return jnp.sum(v.reshape(ts // fs, fs, LANES), axis=0)

    # One-hot via per-class scalar compares (no (C,TS,128) iota, no mask muls);
    # selects instead of cast-then-multiply.
    for c in range(C):
        pc = p[c]
        eq = t == c
        if needs_mask:
            eq = jnp.logical_and(eq, valid)         # garbage labels in padded lanes
        inter_ref[c] += fold(jnp.where(eq, pc, 0.0))
        ysum_ref[c] += fold(jnp.where(eq, 1.0, 0.0))  # onehot^2 == onehot
        zsum_ref[c] += fold(pc * pc)


def dice_loss(inputs_nchw, target_nhw, weight=None, softmax=True):
    """Pallas implementation of DiceLoss.forward. Returns a float32 scalar."""
    N, C, H, W = inputs_nchw.shape
    assert target_nhw.shape == (N, H, W)
    HW = H * W
    G = _cdiv(HW, LANES)

    # Native-dtype, native-layout contiguous views only (no transpose, no cast).
    x = inputs_nchw.reshape(N, C, HW)
    t = target_nhw.reshape(N, HW).astype(jnp.int32)

    pad = G * LANES - HW
    if pad:
        # TODO(synk): non-multiple-of-128 spatial sizes pay one XLA pad pass; a
        # dedicated lane-tiled fallback kernel would avoid it.
        x = jnp.pad(x, ((0, 0), (0, 0), (0, pad)))
        t = jnp.pad(t, ((0, 0), (0, pad)))
    x = x.reshape(N, C, G, LANES)
    t = t.reshape(N, G, LANES)

    isz = jnp.dtype(x.dtype).itemsize
    sub = max(8, 32 // isz)                 # sublane multiple for the logits dtype
    limit, tile_budget = _vmem_plan()
    TS = _choose_ts(G, C, isz, tile_budget, sub)

    # v7x megacore: with no batch parallelism, split the spatial reduction in two.
    if N == 1 and _cdiv(G, TS) == 1 and G >= 2 * sub:
        TS = _round_up(_cdiv(G, 2), sub)
    grid_m = _cdiv(G, TS)
    split = 2 if (N == 1 and grid_m >= 2 and grid_m % 2 == 0) else 1
    m_per = grid_m // split

    FS = 8 if TS % 8 == 0 else TS           # sublane depth of the resident accumulators
    needs_mask = (split * m_per * TS * LANES) != HW

    kernel = functools.partial(
        _dice_kernel, hw=HW, ts=TS, fs=FS, m_per=m_per,
        apply_softmax=softmax, needs_mask=needs_mask)

    acc_shape = jax.ShapeDtypeStruct((split, N, C, FS, LANES), jnp.float32)
    acc_spec = pl.BlockSpec((pl.Squeezed(), pl.Squeezed(), C, FS, LANES),
                            lambda s, n, m: (s, n, 0, 0, 0))

    inter, zsum, ysum = pl.pallas_call(
        kernel,
        out_shape=(acc_shape, acc_shape, acc_shape),
        grid_spec=pltpu.PrefetchScalarGridSpec(
            num_scalar_prefetch=0,
            grid=(split, N, m_per),
            in_specs=[
                pl.BlockSpec((pl.Squeezed(), C, TS, LANES),
                             lambda s, n, m: (n, 0, s * m_per + m, 0)),
                pl.BlockSpec((pl.Squeezed(), TS, LANES),
                             lambda s, n, m: (n, s * m_per + m, 0)),
            ],
            out_specs=(acc_spec, acc_spec, acc_spec),
        ),
        compiler_params=pltpu.CompilerParams(
            dimension_semantics=("parallel", "parallel", "arbitrary"),
            vmem_limit_bytes=limit),
    )(x, t)

    # Cheap wrapper-side finalize: cross-lane/batch/core reduce, dice, weights.
    inter_c = jnp.sum(inter, axis=(0, 1, 3, 4))     # (C,)
    zsum_c = jnp.sum(zsum, axis=(0, 1, 3, 4))
    ysum_c = jnp.sum(ysum, axis=(0, 1, 3, 4))
    dice = 1.0 - (2.0 * inter_c + SMOOTH) / (zsum_c + ysum_c + SMOOTH)
    if weight is None:
        w = jnp.ones((C,), jnp.float32)
    else:
        w = jnp.asarray(weight, jnp.float32).reshape(C)
    return jnp.sum(dice * w) / C


def _dice_loss_ref(inputs_nchw, target_nhw, n_classes, softmax=True):
    # plain-JAX reference mirroring the PyTorch module
    inputs = inputs_nchw.astype(jnp.float32)
    if softmax:
        inputs = jax.nn.softmax(inputs, axis=1)
    onehot = (target_nhw[:, None, :, :] ==
              jnp.arange(n_classes)[None, :, None, None]).astype(jnp.float32)
    loss = 0.0
    for i in range(n_classes):
        s = inputs[:, i]
        tg = onehot[:, i]
        inter = jnp.sum(s * tg)
        y = jnp.sum(tg * tg)
        z = jnp.sum(s * s)
        loss += 1.0 - (2.0 * inter + SMOOTH) / (z + y + SMOOTH)
    return loss / n_classes


if __name__ == "__main__":
    key = jax.random.PRNGKey(0)
    k1, k2 = jax.random.split(key)
    N, C, H, W = 2, 4, 16, 16
    logits = jax.random.normal(k1, (N, C, H, W), dtype=jnp.float32)
    labels = jax.random.randint(k2, (N, H, W), 0, C, dtype=jnp.int32)

    loss = dice_loss(logits, labels, weight=None, softmax=True)
    loss = jax.block_until_ready(loss)

    ref = _dice_loss_ref(logits, labels, C, softmax=True)
    # Tolerance allows for the EUP approximate-reciprocal softmax denominator.
    assert jnp.allclose(loss, ref, atol=5e-3, rtol=5e-3), (loss, ref)

    print("KERNEL_OK")
</pallas_src>

<mosaic_0001>
module attributes {stable_mosaic.version = 11 : i64} {
  func.func @_dice_kernel(%arg0: i32, %arg1: i32, %arg2: i32, %arg3: memref<1x4x2x128xf32, #tpu.memory_space<vmem>>, %arg4: memref<1x2x128xi32, #tpu.memory_space<vmem>>, %arg5: memref<1x1x4x2x128xf32, #tpu.memory_space<vmem>>, %arg6: memref<1x1x4x2x128xf32, #tpu.memory_space<vmem>>, %arg7: memref<1x1x4x2x128xf32, #tpu.memory_space<vmem>>) attributes {dimension_semantics = [#tpu.dimension_semantics<parallel>, #tpu.dimension_semantics<parallel>, #tpu.dimension_semantics<arbitrary>], iteration_bounds = array<i64: 1, 2, 1>, scalar_prefetch = 0 : i64, scratch_operands = 0 : i64, tpu.core_type = #tpu.core_type<tc>, window_params = [{transform_indices = @transform_0, window_bounds = array<i64: 1, 4, 2, 128>}, {transform_indices = @transform_1, window_bounds = array<i64: 1, 2, 128>}, {transform_indices = @transform_2, window_bounds = array<i64: 1, 1, 4, 2, 128>}, {transform_indices = @transform_3, window_bounds = array<i64: 1, 1, 4, 2, 128>}, {transform_indices = @transform_4, window_bounds = array<i64: 1, 1, 4, 2, 128>}]} {
    %c0_i32 = arith.constant 0 : i32
    %0 = arith.cmpi eq, %arg2, %c0_i32 : i32
    %1 = arith.extui %0 : i1 to i32
    %c0_i32_0 = arith.constant 0 : i32
    %2 = arith.cmpi ne, %1, %c0_i32_0 : i32
    scf.if %2 {
      %cst_138 = arith.constant 0.000000e+00 : f32
      %129 = vector.broadcast %cst_138 : f32 to vector<4x2x128xf32>
      %c0_139 = arith.constant 0 : index
      %c0_140 = arith.constant 0 : index
      %c0_141 = arith.constant 0 : index
      %c0_142 = arith.constant 0 : index
      %c0_143 = arith.constant 0 : index
      %130 = vector.load %arg5[%c0_139, %c0_140, %c0_141, %c0_142, %c0_143] : memref<1x1x4x2x128xf32, #tpu.memory_space<vmem>>, vector<1x1x4x2x128xf32>
      %131 = vector.shape_cast %130 : vector<1x1x4x2x128xf32> to vector<4x2x128xf32>
      %132 = vector.shape_cast %129 : vector<4x2x128xf32> to vector<1x1x4x2x128xf32>
      tpu.vector_store %arg5[%c0_139, %c0_140, %c0_141, %c0_142, %c0_143], %132 {strides = array<i32>} : memref<1x1x4x2x128xf32, #tpu.memory_space<vmem>>, vector<1x1x4x2x128xf32>,
      %cst_144 = arith.constant 0.000000e+00 : f32
      %133 = vector.broadcast %cst_144 : f32 to vector<4x2x128xf32>
      %c0_145 = arith.constant 0 : index
      %c0_146 = arith.constant 0 : index
      %c0_147 = arith.constant 0 : index
      %c0_148 = arith.constant 0 : index
      %c0_149 = arith.constant 0 : index
      %134 = vector.load %arg6[%c0_145, %c0_146, %c0_147, %c0_148, %c0_149] : memref<1x1x4x2x128xf32, #tpu.memory_space<vmem>>, vector<1x1x4x2x128xf32>
      %135 = vector.shape_cast %134 : vector<1x1x4x2x128xf32> to vector<4x2x128xf32>
      %136 = vector.shape_cast %133 : vector<4x2x128xf32> to vector<1x1x4x2x128xf32>
      tpu.vector_store %arg6[%c0_145, %c0_146, %c0_147, %c0_148, %c0_149], %136 {strides = array<i32>} : memref<1x1x4x2x128xf32, #tpu.memory_space<vmem>>, vector<1x1x4x2x128xf32>,
      %cst_150 = arith.constant 0.000000e+00 : f32
      %137 = vector.broadcast %cst_150 : f32 to vector<4x2x128xf32>
      %c0_151 = arith.constant 0 : index
      %c0_152 = arith.constant 0 : index
      %c0_153 = arith.constant 0 : index
      %c0_154 = arith.constant 0 : index
      %c0_155 = arith.constant 0 : index
      %138 = vector.load %arg7[%c0_151, %c0_152, %c0_153, %c0_154, %c0_155] : memref<1x1x4x2x128xf32, #tpu.memory_space<vmem>>, vector<1x1x4x2x128xf32>
      %139 = vector.shape_cast %138 : vector<1x1x4x2x128xf32> to vector<4x2x128xf32>
      %140 = vector.shape_cast %137 : vector<4x2x128xf32> to vector<1x1x4x2x128xf32>
      tpu.vector_store %arg7[%c0_151, %c0_152, %c0_153, %c0_154, %c0_155], %140 {strides = array<i32>} : memref<1x1x4x2x128xf32, #tpu.memory_space<vmem>>, vector<1x1x4x2x128xf32>,
    } else {
    }
    %c0 = arith.constant 0 : index
    %c0_1 = arith.constant 0 : index
    %c0_2 = arith.constant 0 : index
    %c0_3 = arith.constant 0 : index
    %3 = vector.load %arg3[%c0, %c0_1, %c0_2, %c0_3] : memref<1x4x2x128xf32, #tpu.memory_space<vmem>>, vector<1x4x2x128xf32>
    %4 = vector.shape_cast %3 : vector<1x4x2x128xf32> to vector<4x2x128xf32>
    %c0_4 = arith.constant 0 : index
    %c0_5 = arith.constant 0 : index
    %c0_6 = arith.constant 0 : index
    %5 = vector.load %arg4[%c0_4, %c0_5, %c0_6] : memref<1x2x128xi32, #tpu.memory_space<vmem>>, vector<1x2x128xi32>
    %6 = vector.shape_cast %5 : vector<1x2x128xi32> to vector<2x128xi32>
    %cst = arith.constant dense<0xFF800000> : vector<2x128xf32>
    %7 = vector.multi_reduction <maximumf>, %4, %cst [0] : vector<4x2x128xf32> to vector<2x128xf32>
    %8 = vector.shape_cast %7 : vector<2x128xf32> to vector<1x2x128xf32>
    %9 = vector.broadcast %8 : vector<1x2x128xf32> to vector<4x2x128xf32>
    %10 = arith.subf %4, %9 : vector<4x2x128xf32>
    %11 = math.exp %10 : vector<4x2x128xf32>
    %cst_7 = arith.constant dense<0.000000e+00> : vector<2x128xf32>
    %12 = vector.multi_reduction <add>, %11, %cst_7 [0] : vector<4x2x128xf32> to vector<2x128xf32>
    %13 = vector.shape_cast %12 : vector<2x128xf32> to vector<1x2x128xf32>
    %14 = tpu.reciprocal %13 {approx = true} : vector<1x2x128xf32> -> vector<1x2x128xf32>
    %15 = vector.broadcast %14 : vector<1x2x128xf32> to vector<4x2x128xf32>
    %16 = arith.mulf %11, %15 : vector<4x2x128xf32>
    %17 = vector.extract_strided_slice %16 {offsets = [0, 0, 0], sizes = [1, 2, 128], strides = [1, 1, 1]} : vector<4x2x128xf32> to vector<1x2x128xf32>
    %18 = vector.shape_cast %17 : vector<1x2x128xf32> to vector<2x128xf32>
    %c0_i32_8 = arith.constant 0 : i32
    %19 = vector.broadcast %c0_i32_8 : i32 to vector<2x128xi32>
    %20 = arith.cmpi eq, %6, %19 : vector<2x128xi32>
    %c0_9 = arith.constant 0 : index
    %c0_10 = arith.constant 0 : index
    %c0_11 = arith.constant 0 : index
    %c0_12 = arith.constant 0 : index
    %c0_13 = arith.constant 0 : index
    %21 = vector.load %arg5[%c0_9, %c0_10, %c0_11, %c0_12, %c0_13] : memref<1x1x4x2x128xf32, #tpu.memory_space<vmem>>, vector<1x1x1x2x128xf32>
    %22 = vector.shape_cast %21 : vector<1x1x1x2x128xf32> to vector<2x128xf32>
    %cst_14 = arith.constant 0.000000e+00 : f32
    %23 = vector.broadcast %cst_14 : f32 to vector<2x128xf32>
    %24 = arith.select %20, %18, %23 : vector<2x128xi1>, vector<2x128xf32>
    %25 = arith.addf %22, %24 : vector<2x128xf32>
    %c0_15 = arith.constant 0 : index
    %c0_16 = arith.constant 0 : index
    %c0_17 = arith.constant 0 : index
    %c0_18 = arith.constant 0 : index
    %c0_19 = arith.constant 0 : index
    %26 = vector.load %arg5[%c0_15, %c0_16, %c0_17, %c0_18, %c0_19] : memref<1x1x4x2x128xf32, #tpu.memory_space<vmem>>, vector<1x1x1x2x128xf32>
    %27 = vector.shape_cast %26 : vector<1x1x1x2x128xf32> to vector<2x128xf32>
    %28 = vector.shape_cast %25 : vector<2x128xf32> to vector<1x1x1x2x128xf32>
    tpu.vector_store %arg5[%c0_15, %c0_16, %c0_17, %c0_18, %c0_19], %28 {strides = array<i32>} : memref<1x1x4x2x128xf32, #tpu.memory_space<vmem>>, vector<1x1x1x2x128xf32>,
    %c0_20 = arith.constant 0 : index
    %c0_21 = arith.constant 0 : index
    %c0_22 = arith.constant 0 : index
    %c0_23 = arith.constant 0 : index
    %c0_24 = arith.constant 0 : index
    %29 = vector.load %arg7[%c0_20, %c0_21, %c0_22, %c0_23, %c0_24] : memref<1x1x4x2x128xf32, #tpu.memory_space<vmem>>, vector<1x1x1x2x128xf32>
    %30 = vector.shape_cast %29 : vector<1x1x1x2x128xf32> to vector<2x128xf32>
    %cst_25 = arith.constant 1.000000e+00 : f32
    %cst_26 = arith.constant 0.000000e+00 : f32
    %31 = vector.broadcast %cst_25 : f32 to vector<2x128xf32>
    %32 = vector.broadcast %cst_26 : f32 to vector<2x128xf32>
    %33 = arith.select %20, %31, %32 : vector<2x128xi1>, vector<2x128xf32>
    %34 = arith.addf %30, %33 : vector<2x128xf32>
    %c0_27 = arith.constant 0 : index
    %c0_28 = arith.constant 0 : index
    %c0_29 = arith.constant 0 : index
    %c0_30 = arith.constant 0 : index
    %c0_31 = arith.constant 0 : index
    %35 = vector.load %arg7[%c0_27, %c0_28, %c0_29, %c0_30, %c0_31] : memref<1x1x4x2x128xf32, #tpu.memory_space<vmem>>, vector<1x1x1x2x128xf32>
    %36 = vector.shape_cast %35 : vector<1x1x1x2x128xf32> to vector<2x128xf32>
    %37 = vector.shape_cast %34 : vector<2x128xf32> to vector<1x1x1x2x128xf32>
    tpu.vector_store %arg7[%c0_27, %c0_28, %c0_29, %c0_30, %c0_31], %37 {strides = array<i32>} : memref<1x1x4x2x128xf32, #tpu.memory_space<vmem>>, vector<1x1x1x2x128xf32>,
    %c0_32 = arith.constant 0 : index
    %c0_33 = arith.constant 0 : index
    %c0_34 = arith.constant 0 : index
    %c0_35 = arith.constant 0 : index
    %c0_36 = arith.constant 0 : index
    %38 = vector.load %arg6[%c0_32, %c0_33, %c0_34, %c0_35, %c0_36] : memref<1x1x4x2x128xf32, #tpu.memory_space<vmem>>, vector<1x1x1x2x128xf32>
    %39 = vector.shape_cast %38 : vector<1x1x1x2x128xf32> to vector<2x128xf32>
    %40 = arith.mulf %18, %18 : vector<2x128xf32>
    %41 = arith.addf %39, %40 : vector<2x128xf32>
    %c0_37 = arith.constant 0 : index
    %c0_38 = arith.constant 0 : index
    %c0_39 = arith.constant 0 : index
    %c0_40 = arith.constant 0 : index
    %c0_41 = arith.constant 0 : index
    %42 = vector.load %arg6[%c0_37, %c0_38, %c0_39, %c0_40, %c0_41] : memref<1x1x4x2x128xf32, #tpu.memory_space<vmem>>, vector<1x1x1x2x128xf32>
    %43 = vector.shape_cast %42 : vector<1x1x1x2x128xf32> to vector<2x128xf32>
    %44 = vector.shape_cast %41 : vector<2x128xf32> to vector<1x1x1x2x128xf32>
    tpu.vector_store %arg6[%c0_37, %c0_38, %c0_39, %c0_40, %c0_41], %44 {strides = array<i32>} : memref<1x1x4x2x128xf32, #tpu.memory_space<vmem>>, vector<1x1x1x2x128xf32>,
    %45 = vector.extract_strided_slice %16 {offsets = [1, 0, 0], sizes = [1, 2, 128], strides = [1, 1, 1]} : vector<4x2x128xf32> to vector<1x2x128xf32>
    %46 = vector.shape_cast %45 : vector<1x2x128xf32> to vector<2x128xf32>
    %c1_i32 = arith.constant 1 : i32
    %47 = vector.broadcast %c1_i32 : i32 to vector<2x128xi32>
    %48 = arith.cmpi eq, %6, %47 : vector<2x128xi32>
    %c0_42 = arith.constant 0 : index
    %c0_43 = arith.constant 0 : index
    %c1 = arith.constant 1 : index
    %c0_44 = arith.constant 0 : index
    %c0_45 = arith.constant 0 : index
    %49 = vector.load %arg5[%c0_42, %c0_43, %c1, %c0_44, %c0_45] : memref<1x1x4x2x128xf32, #tpu.memory_space<vmem>>, vector<1x1x1x2x128xf32>
    %50 = vector.shape_cast %49 : vector<1x1x1x2x128xf32> to vector<2x128xf32>
    %cst_46 = arith.constant 0.000000e+00 : f32
    %51 = vector.broadcast %cst_46 : f32 to vector<2x128xf32>
    %52 = arith.select %48, %46, %51 : vector<2x128xi1>, vector<2x128xf32>
    %53 = arith.addf %50, %52 : vector<2x128xf32>
    %c0_47 = arith.constant 0 : index
    %c0_48 = arith.constant 0 : index
    %c1_49 = arith.constant 1 : index
    %c0_50 = arith.constant 0 : index
    %c0_51 = arith.constant 0 : index
    %54 = vector.load %arg5[%c0_47, %c0_48, %c1_49, %c0_50, %c0_51] : memref<1x1x4x2x128xf32, #tpu.memory_space<vmem>>, vector<1x1x1x2x128xf32>
    %55 = vector.shape_cast %54 : vector<1x1x1x2x128xf32> to vector<2x128xf32>
    %56 = vector.shape_cast %53 : vector<2x128xf32> to vector<1x1x1x2x128xf32>
    tpu.vector_store %arg5[%c0_47, %c0_48, %c1_49, %c0_50, %c0_51], %56 {strides = array<i32>} : memref<1x1x4x2x128xf32, #tpu.memory_space<vmem>>, vector<1x1x1x2x128xf32>,
    %c0_52 = arith.constant 0 : index
    %c0_53 = arith.constant 0 : index
    %c1_54 = arith.constant 1 : index
    %c0_55 = arith.constant 0 : index
    %c0_56 = arith.constant 0 : index
    %57 = vector.load %arg7[%c0_52, %c0_53, %c1_54, %c0_55, %c0_56] : memref<1x1x4x2x128xf32, #tpu.memory_space<vmem>>, vector<1x1x1x2x128xf32>
    %58 = vector.shape_cast %57 : vector<1x1x1x2x128xf32> to vector<2x128xf32>
    %cst_57 = arith.constant 1.000000e+00 : f32
    %cst_58 = arith.constant 0.000000e+00 : f32
    %59 = vector.broadcast %cst_57 : f32 to vector<2x128xf32>
    %60 = vector.broadcast %cst_58 : f32 to vector<2x128xf32>
    %61 = arith.select %48, %59, %60 : vector<2x128xi1>, vector<2x128xf32>
    %62 = arith.addf %58, %61 : vector<2x128xf32>
    %c0_59 = arith.constant 0 : index
    %c0_60 = arith.constant 0 : index
    %c1_61 = arith.constant 1 : index
    %c0_62 = arith.constant 0 : index
    %c0_63 = arith.constant 0 : index
    %63 = vector.load %arg7[%c0_59, %c0_60, %c1_61, %c0_62, %c0_63] : memref<1x1x4x2x128xf32, #tpu.memory_space<vmem>>, vector<1x1x1x2x128xf32>
    %64 = vector.shape_cast %63 : vector<1x1x1x2x128xf32> to vector<2x128xf32>
    %65 = vector.shape_cast %62 : vector<2x128xf32> to vector<1x1x1x2x128xf32>
    tpu.vector_store %arg7[%c0_59, %c0_60, %c1_61, %c0_62, %c0_63], %65 {strides = array<i32>} : memref<1x1x4x2x128xf32, #tpu.memory_space<vmem>>, vector<1x1x1x2x128xf32>,
    %c0_64 = arith.constant 0 : index
    %c0_65 = arith.constant 0 : index
    %c1_66 = arith.constant 1 : index
    %c0_67 = arith.constant 0 : index
    %c0_68 = arith.constant 0 : index
    %66 = vector.load %arg6[%c0_64, %c0_65, %c1_66, %c0_67, %c0_68] : memref<1x1x4x2x128xf32, #tpu.memory_space<vmem>>, vector<1x1x1x2x128xf32>
    %67 = vector.shape_cast %66 : vector<1x1x1x2x128xf32> to vector<2x128xf32>
    %68 = arith.mulf %46, %46 : vector<2x128xf32>
    %69 = arith.addf %67, %68 : vector<2x128xf32>
    %c0_69 = arith.constant 0 : index
    %c0_70 = arith.constant 0 : index
    %c1_71 = arith.constant 1 : index
    %c0_72 = arith.constant 0 : index
    %c0_73 = arith.constant 0 : index
    %70 = vector.load %arg6[%c0_69, %c0_70, %c1_71, %c0_72, %c0_73] : memref<1x1x4x2x128xf32, #tpu.memory_space<vmem>>, vector<1x1x1x2x128xf32>
    %71 = vector.shape_cast %70 : vector<1x1x1x2x128xf32> to vector<2x128xf32>
    %72 = vector.shape_cast %69 : vector<2x128xf32> to vector<1x1x1x2x128xf32>
    tpu.vector_store %arg6[%c0_69, %c0_70, %c1_71, %c0_72, %c0_73], %72 {strides = array<i32>} : memref<1x1x4x2x128xf32, #tpu.memory_space<vmem>>, vector<1x1x1x2x128xf32>,
    %73 = vector.extract_strided_slice %16 {offsets = [2, 0, 0], sizes = [1, 2, 128], strides = [1, 1, 1]} : vector<4x2x128xf32> to vector<1x2x128xf32>
    %74 = vector.shape_cast %73 : vector<1x2x128xf32> to vector<2x128xf32>
    %c2_i32 = arith.constant 2 : i32
    %75 = vector.broadcast %c2_i32 : i32 to vector<2x128xi32>
    %76 = arith.cmpi eq, %6, %75 : vector<2x128xi32>
    %c0_74 = arith.constant 0 : index
    %c0_75 = arith.constant 0 : index
    %c2 = arith.constant 2 : index
    %c0_76 = arith.constant 0 : index
    %c0_77 = arith.constant 0 : index
    %77 = vector.load %arg5[%c0_74, %c0_75, %c2, %c0_76, %c0_77] : memref<1x1x4x2x128xf32, #tpu.memory_space<vmem>>, vector<1x1x1x2x128xf32>
    %78 = vector.shape_cast %77 : vector<1x1x1x2x128xf32> to vector<2x128xf32>
    %cst_78 = arith.constant 0.000000e+00 : f32
    %79 = vector.broadcast %cst_78 : f32 to vector<2x128xf32>
    %80 = arith.select %76, %74, %79 : vector<2x128xi1>, vector<2x128xf32>
    %81 = arith.addf %78, %80 : vector<2x128xf32>
    %c0_79 = arith.constant 0 : index
    %c0_80 = arith.constant 0 : index
    %c2_81 = arith.constant 2 : index
    %c0_82 = arith.constant 0 : index
    %c0_83 = arith.constant 0 : index
    %82 = vector.load %arg5[%c0_79, %c0_80, %c2_81, %c0_82, %c0_83] : memref<1x1x4x2x128xf32, #tpu.memory_space<vmem>>, vector<1x1x1x2x128xf32>
    %83 = vector.shape_cast %82 : vector<1x1x1x2x128xf32> to vector<2x128xf32>
    %84 = vector.shape_cast %81 : vector<2x128xf32> to vector<1x1x1x2x128xf32>
    tpu.vector_store %arg5[%c0_79, %c0_80, %c2_81, %c0_82, %c0_83], %84 {strides = array<i32>} : memref<1x1x4x2x128xf32, #tpu.memory_space<vmem>>, vector<1x1x1x2x128xf32>,
    %c0_84 = arith.constant 0 : index
    %c0_85 = arith.constant 0 : index
    %c2_86 = arith.constant 2 : index
    %c0_87 = arith.constant 0 : index
    %c0_88 = arith.constant 0 : index
    %85 = vector.load %arg7[%c0_84, %c0_85, %c2_86, %c0_87, %c0_88] : memref<1x1x4x2x128xf32, #tpu.memory_space<vmem>>, vector<1x1x1x2x128xf32>
    %86 = vector.shape_cast %85 : vector<1x1x1x2x128xf32> to vector<2x128xf32>
    %cst_89 = arith.constant 1.000000e+00 : f32
    %cst_90 = arith.constant 0.000000e+00 : f32
    %87 = vector.broadcast %cst_89 : f32 to vector<2x128xf32>
    %88 = vector.broadcast %cst_90 : f32 to vector<2x128xf32>
    %89 = arith.select %76, %87, %88 : vector<2x128xi1>, vector<2x128xf32>
    %90 = arith.addf %86, %89 : vector<2x128xf32>
    %c0_91 = arith.constant 0 : index
    %c0_92 = arith.constant 0 : index
    %c2_93 = arith.constant 2 : index
    %c0_94 = arith.constant 0 : index
    %c0_95 = arith.constant 0 : index
    %91 = vector.load %arg7[%c0_91, %c0_92, %c2_93, %c0_94, %c0_95] : memref<1x1x4x2x128xf32, #tpu.memory_space<vmem>>, vector<1x1x1x2x128xf32>
    %92 = vector.shape_cast %91 : vector<1x1x1x2x128xf32> to vector<2x128xf32>
    %93 = vector.shape_cast %90 : vector<2x128xf32> to vector<1x1x1x2x128xf32>
    tpu.vector_store %arg7[%c0_91, %c0_92, %c2_93, %c0_94, %c0_95], %93 {strides = array<i32>} : memref<1x1x4x2x128xf32, #tpu.memory_space<vmem>>, vector<1x1x1x2x128xf32>,
    %c0_96 = arith.constant 0 : index
    %c0_97 = arith.constant 0 : index
    %c2_98 = arith.constant 2 : index
    %c0_99 = arith.constant 0 : index
    %c0_100 = arith.constant 0 : index
    %94 = vector.load %arg6[%c0_96, %c0_97, %c2_98, %c0_99, %c0_100] : memref<1x1x4x2x128xf32, #tpu.memory_space<vmem>>, vector<1x1x1x2x128xf32>
    %95 = vector.shape_cast %94 : vector<1x1x1x2x128xf32> to vector<2x128xf32>
    %96 = arith.mulf %74, %74 : vector<2x128xf32>
    %97 = arith.addf %95, %96 : vector<2x128xf32>
    %c0_101 = arith.constant 0 : index
    %c0_102 = arith.constant 0 : index
    %c2_103 = arith.constant 2 : index
    %c0_104 = arith.constant 0 : index
    %c0_105 = arith.constant 0 : index
    %98 = vector.load %arg6[%c0_101, %c0_102, %c2_103, %c0_104, %c0_105] : memref<1x1x4x2x128xf32, #tpu.memory_space<vmem>>, vector<1x1x1x2x128xf32>
    %99 = vector.shape_cast %98 : vector<1x1x1x2x128xf32> to vector<2x128xf32>
    %100 = vector.shape_cast %97 : vector<2x128xf32> to vector<1x1x1x2x128xf32>
    tpu.vector_store %arg6[%c0_101, %c0_102, %c2_103, %c0_104, %c0_105], %100 {strides = array<i32>} : memref<1x1x4x2x128xf32, #tpu.memory_space<vmem>>, vector<1x1x1x2x128xf32>,
    %101 = vector.extract_strided_slice %16 {offsets = [3, 0, 0], sizes = [1, 2, 128], strides = [1, 1, 1]} : vector<4x2x128xf32> to vector<1x2x128xf32>
    %102 = vector.shape_cast %101 : vector<1x2x128xf32> to vector<2x128xf32>
    %c3_i32 = arith.constant 3 : i32
    %103 = vector.broadcast %c3_i32 : i32 to vector<2x128xi32>
    %104 = arith.cmpi eq, %6, %103 : vector<2x128xi32>
    %c0_106 = arith.constant 0 : index
    %c0_107 = arith.constant 0 : index
    %c3 = arith.constant 3 : index
    %c0_108 = arith.constant 0 : index
    %c0_109 = arith.constant 0 : index
    %105 = vector.load %arg5[%c0_106, %c0_107, %c3, %c0_108, %c0_109] : memref<1x1x4x2x128xf32, #tpu.memory_space<vmem>>, vector<1x1x1x2x128xf32>
    %106 = vector.shape_cast %105 : vector<1x1x1x2x128xf32> to vector<2x128xf32>
    %cst_110 = arith.constant 0.000000e+00 : f32
    %107 = vector.broadcast %cst_110 : f32 to vector<2x128xf32>
    %108 = arith.select %104, %102, %107 : vector<2x128xi1>, vector<2x128xf32>
    %109 = arith.addf %106, %108 : vector<2x128xf32>
    %c0_111 = arith.constant 0 : index
    %c0_112 = arith.constant 0 : index
    %c3_113 = arith.constant 3 : index
    %c0_114 = arith.constant 0 : index
    %c0_115 = arith.constant 0 : index
    %110 = vector.load %arg5[%c0_111, %c0_112, %c3_113, %c0_114, %c0_115] : memref<1x1x4x2x128xf32, #tpu.memory_space<vmem>>, vector<1x1x1x2x128xf32>
    %111 = vector.shape_cast %110 : vector<1x1x1x2x128xf32> to vector<2x128xf32>
    %112 = vector.shape_cast %109 : vector<2x128xf32> to vector<1x1x1x2x128xf32>
    tpu.vector_store %arg5[%c0_111, %c0_112, %c3_113, %c0_114, %c0_115], %112 {strides = array<i32>} : memref<1x1x4x2x128xf32, #tpu.memory_space<vmem>>, vector<1x1x1x2x128xf32>,
    %c0_116 = arith.constant 0 : index
    %c0_117 = arith.constant 0 : index
    %c3_118 = arith.constant 3 : index
    %c0_119 = arith.constant 0 : index
    %c0_120 = arith.constant 0 : index
    %113 = vector.load %arg7[%c0_116, %c0_117, %c3_118, %c0_119, %c0_120] : memref<1x1x4x2x128xf32, #tpu.memory_space<vmem>>, vector<1x1x1x2x128xf32>
    %114 = vector.shape_cast %113 : vector<1x1x1x2x128xf32> to vector<2x128xf32>
    %cst_121 = arith.constant 1.000000e+00 : f32
    %cst_122 = arith.constant 0.000000e+00 : f32
    %115 = vector.broadcast %cst_121 : f32 to vector<2x128xf32>
    %116 = vector.broadcast %cst_122 : f32 to vector<2x128xf32>
    %117 = arith.select %104, %115, %116 : vector<2x128xi1>, vector<2x128xf32>
    %118 = arith.addf %114, %117 : vector<2x128xf32>
    %c0_123 = arith.constant 0 : index
    %c0_124 = arith.constant 0 : index
    %c3_125 = arith.constant 3 : index
    %c0_126 = arith.constant 0 : index
    %c0_127 = arith.constant 0 : index
    %119 = vector.load %arg7[%c0_123, %c0_124, %c3_125, %c0_126, %c0_127] : memref<1x1x4x2x128xf32, #tpu.memory_space<vmem>>, vector<1x1x1x2x128xf32>
    %120 = vector.shape_cast %119 : vector<1x1x1x2x128xf32> to vector<2x128xf32>
    %121 = vector.shape_cast %118 : vector<2x128xf32> to vector<1x1x1x2x128xf32>
    tpu.vector_store %arg7[%c0_123, %c0_124, %c3_125, %c0_126, %c0_127], %121 {strides = array<i32>} : memref<1x1x4x2x128xf32, #tpu.memory_space<vmem>>, vector<1x1x1x2x128xf32>,
    %c0_128 = arith.constant 0 : index
    %c0_129 = arith.constant 0 : index
    %c3_130 = arith.constant 3 : index
    %c0_131 = arith.constant 0 : index
    %c0_132 = arith.constant 0 : index
    %122 = vector.load %arg6[%c0_128, %c0_129, %c3_130, %c0_131, %c0_132] : memref<1x1x4x2x128xf32, #tpu.memory_space<vmem>>, vector<1x1x1x2x128xf32>
    %123 = vector.shape_cast %122 : vector<1x1x1x2x128xf32> to vector<2x128xf32>
    %124 = arith.mulf %102, %102 : vector<2x128xf32>
    %125 = arith.addf %123, %124 : vector<2x128xf32>
    %c0_133 = arith.constant 0 : index
    %c0_134 = arith.constant 0 : index
    %c3_135 = arith.constant 3 : index
    %c0_136 = arith.constant 0 : index
    %c0_137 = arith.constant 0 : index
    %126 = vector.load %arg6[%c0_133, %c0_134, %c3_135, %c0_136, %c0_137] : memref<1x1x4x2x128xf32, #tpu.memory_space<vmem>>, vector<1x1x1x2x128xf32>
    %127 = vector.shape_cast %126 : vector<1x1x1x2x128xf32> to vector<2x128xf32>
    %128 = vector.shape_cast %125 : vector<2x128xf32> to vector<1x1x1x2x128xf32>
    tpu.vector_store %arg6[%c0_133, %c0_134, %c3_135, %c0_136, %c0_137], %128 {strides = array<i32>} : memref<1x1x4x2x128xf32, #tpu.memory_space<vmem>>, vector<1x1x1x2x128xf32>,
    return
  }
  func.func @transform_0(%arg0: i32, %arg1: i32, %arg2: i32) -> (i32, i32, i32, i32) {
    %c1_i32 = arith.constant 1 : i32
    %0 = arith.muli %arg0, %c1_i32 : i32
    %1 = arith.addi %0, %arg2 : i32
    %c0_i32 = arith.constant 0 : i32
    %c0_i32_0 = arith.constant 0 : i32
    %c0_i32_1 = arith.constant 0 : i32
    return %arg1, %c0_i32, %1, %c0_i32_0 : i32, i32, i32, i32
  }
  func.func @transform_1(%arg0: i32, %arg1: i32, %arg2: i32) -> (i32, i32, i32) {
    %c1_i32 = arith.constant 1 : i32
    %0 = arith.muli %arg0, %c1_i32 : i32
    %1 = arith.addi %0, %arg2 : i32
    %c0_i32 = arith.constant 0 : i32
    %c0_i32_0 = arith.constant 0 : i32
    return %arg1, %1, %c0_i32 : i32, i32, i32
  }
  func.func @transform_2(%arg0: i32, %arg1: i32, %arg2: i32) -> (i32, i32, i32, i32, i32) {
    %c0_i32 = arith.constant 0 : i32
    %c0_i32_0 = arith.constant 0 : i32
    %c0_i32_1 = arith.constant 0 : i32
    %c0_i32_2 = arith.constant 0 : i32
    return %arg0, %arg1, %c0_i32, %c0_i32_0, %c0_i32_1 : i32, i32, i32, i32, i32
  }
  func.func @transform_3(%arg0: i32, %arg1: i32, %arg2: i32) -> (i32, i32, i32, i32, i32) {
    %c0_i32 = arith.constant 0 : i32
    %c0_i32_0 = arith.constant 0 : i32
    %c0_i32_1 = arith.constant 0 : i32
    %c0_i32_2 = arith.constant 0 : i32
    return %arg0, %arg1, %c0_i32, %c0_i32_0, %c0_i32_1 : i32, i32, i32, i32, i32
  }
  func.func @transform_4(%arg0: i32, %arg1: i32, %arg2: i32) -> (i32, i32, i32, i32, i32) {
    %c0_i32 = arith.constant 0 : i32
    %c0_i32_0 = arith.constant 0 : i32
    %c0_i32_1 = arith.constant 0 : i32
    %c0_i32_2 = arith.constant 0 : i32
    return %arg0, %arg1, %c0_i32, %c0_i32_0, %c0_i32_1 : i32, i32, i32, i32, i32
  }
}

</mosaic_0001>

<bundles_post_ra>
// kernel: tpu_custom_call.1
= control target key start
LH: loop header
LB: loop body
LE: loop exit
PB: predicated region body
PF: predicated region fallthrough
CT: control target
= control target key end

     0   :  { %s1353_s0 = inlined_call_operand.hbm [shape: f32[2,4,2,128], index: 0, kind: input, shape index: {}]   ;;  %s1354_s1 = inlined_call_operand.hbm [shape: s32[2,2,128], index: 1, kind: input, shape index: {}]   ;;  %s1355_s2 = inlined_call_operand.hbm [shape: f32[1,2,4,2,128], index: 2, kind: output, shape index: {0}]   ;;  %s1356_s3 = inlined_call_operand.hbm [shape: f32[1,2,4,2,128], index: 3, kind: output, shape index: {1}]   ;;  %s1357_s4 = inlined_call_operand.hbm [shape: f32[1,2,4,2,128], index: 4, kind: output, shape index: {2}]  }
   0x1   :  { %1360 = sst [smem:[#allocation16_spill]] %s1353_s0 }
   0x2   :  { %10 = vsyncpa [#allocation3], 0 }
   0x3   :  { %12 = vsyncpa [#allocation3 + $0x1], 0 }
   0x4   :  { %13 = vsyncpa [#allocation6], 0 }
   0x5   :  { %15 = vsyncpa [#allocation6 + $0x1], 0 }
   0x6   :  { %16 = vsyncpa [#allocation4], 0 }
   0x7   :  { %18 = vsyncpa [#allocation4 + $0x1], 0 }
   0x8   :  { %19 = vsyncpa [#allocation9], 0 }
   0x9   :  { %21 = vsyncpa [#allocation9 + $0x1], 0  ;;  %s1056_s15 = smov 0   ;;  %s1058_s16 = smov 0  }
   0xa   :  { %s1060_s17 = smov 0   ;;  %s1062_s18 = smov 0  }
   0xb   :  { %s1064_s19 = smov 0   ;;  %s1066_s20 = smov 0  }
   0xc LB: > { %s1087_s21 = sadd.s32 4294967295, %s1024_s20   ;;  %s1358_s22 = sadd.s32 4294967294, %s1024_s20   ;;  %s1024_s20 = sphi %s1066_s20, %s27_s20   ;;  %s1020_s19 = sphi %s1064_s19, %s1374_s19   ;;  %s1016_s18 = sphi %s1062_s18, %s1373_s18   ;;  %s1012_s17 = sphi %s1060_s17, %s1372_s17   ;;  %s1008_s16 = sphi %s1058_s16, %s1371_s16   ;;  %s1004_s15 = sphi %s1056_s15, %s1370_s15  }
   0xd   : > { %s42_s23 = sadd.s32 1, %s1020_s19  ;;  %s57_s24 = sadd.s32 1, %s1012_s17 }
   0xe   : > { %p44_p0 = scmp.ge.s32.totalorder %s42_s23, 2  ;;  %p64_p1 = scmp.ne.s32.totalorder %s1012_s17, %s1008_s16 }
   0xf   : > { %p65_p2 = scmp.eq.s32.totalorder %s1024_s20, 0  ;;  %p70_p3 = scmp.ne.s32.totalorder %s1008_s16, %s1004_s15 }
  0x10   : > { %s1376_s23 = smov (%p44_p0, %s42_s23), 0  ;;  %p71_p5 = scmp.eq.s32.totalorder %s1087_s21, 0 }
  0x11   : > { %1361 = sst [smem:[#allocation15_spill]] %s1376_s23  ;;  %p1099_p4 = por %p65_p2, %p64_p1 }
  0x12   : > { %s52_s26 = ssub.s32 %s1020_s19, %s1376_s23  ;;  %p126_p6 = scmp.eq.s32.totalorder %s1087_s21, 1 }
  0x13   : > { %p55_p7 = scmp.eq.s32.totalorder %s52_s26, 0  ;;  %p1107_p8 = por %p71_p5, %p70_p3 }
  0x14   : > { %p1111_p9 = por %p126_p6, %p64_p1  ;;  %p132_p10 = scmp.eq.s32.totalorder %s1358_s22, 1 }
  0x15   : > { %s1118_s29 = scalar_select %p55_p7, %s1012_s17, %s57_s24  }
  0x16   : > { %p1120_p11 = por %p132_p10, %p70_p3  ;;  %p681_p12 = scmp.ge.s32.totalorder %s1024_s20, 2 }
  0x17   : > { %p753_p13 = scmp.lt.s32.totalorder %s1024_s20, 2  ;;  %s208_s5 = sand.u32 1, %s1012_s17  }
  0x18   : > { %s682_s6 = sshll.u32 %s208_s5, 3  ;;  %s722_s7 = sshll.u32 %s1020_s19, 3 }
  0x19   : > { %s1366_s0 = sld [smem:[#allocation16_spill]]  ;;  %s212_s11 = scalar_lea.vmem [#allocation2], %s682_s6 }
  0x1a   : > { %s222_s12 = sshll.u32 %s212_s11, 4  ;;  %p1133_p0 = pnand %p753_p13, %p1099_p4  ;;  %s223_s12 = int_to_ptr.vmem [resolvable:$true] %s222_s12 }
  0x1b   : > { %p687_p1 = scmp.ge.s32.totalorder %s1024_s20, 1  ;;  %s209_s24 = scalar_lea.sflag [#allocation3], %s208_s5 }
  0x1c   : > { %s1026_s26 = smov 32   ;;  %s1027_s22 = smov 2  }
  0x1d   : > { %p251_p2 = scmp.lt.s32.totalorder %s1024_s20, 3  ;;  %s686_s6 = sshll.u32 %s1020_s19, 1 }
  0x1e   : > { %s242_s25 = scalar_lea.hbm %s1354_s1, %s686_s6  ;;  %s233_s23 = scalar_lea.sflag [#allocation6], %s208_s5 }
  0x1f   : > { %s219_s10 = scalar_lea.hbm %s1366_s0, %s722_s7  ;;  %s685_s7 = sshll.u32 %s208_s5, 1 }
  0x20   : > { %s220_s13 = sshll.u32 %s219_s10, 4  ;;  %p252_p3 = pnand %p687_p1, %p251_p2  ;;  %s221_s13 = int_to_ptr.hbm [resolvable:$true] %s220_s13 }
  0x21   : > { %739 = dma.hbm_to_vmem [thread:$0]  (!%p1133_p0), %s221_s13, 128, %s223_s12, %s209_s24, %s1026_s26, %s1026_s26, %s1027_s22  }
  0x22   : > { %s236_s10 = scalar_lea.vmem [#allocation5], %s685_s7  ;;  %s244_s0 = sshll.u32 %s242_s25, 4  ;;  %s245_s0 = int_to_ptr.hbm [resolvable:$true] %s244_s0 }
  0x23   : > { %s246_s11 = sshll.u32 %s236_s10, 4  ;;  %255 = sbr.rel (%p252_p3) target bundleno = 119 (0x77), region = 28  ;;  %s247_s11 = int_to_ptr.vmem [resolvable:$true] %s246_s11 }
  0x24   : > { %742 = dma.hbm_to_vmem [thread:$0]  (!%p1133_p0), %s245_s0, 32, %s247_s11, %s233_s23  }
  0x25   : > { %s1148_s22 = sand.u32 (!%p252_p3), 1, %s1008_s16  }
  0x26   : > { %s688_s12 = sshll.u32 (!%p252_p3), %s1148_s22, 3  ;;  %s258_s13 = scalar_lea.sflag (!%p252_p3), [#allocation3], %s1148_s22 }
  0x27   : > { %s261_s24 = scalar_lea.vmem (!%p252_p3), [#allocation2], %s688_s12 }
  0x28   : > { %987 = dma.done.wait (%p1107_p8), %s258_s13, 128  }
  0x29   : > { %989 = vsyncadd (%p1107_p8), %s258_s13, 4294967168  ;;  %s689_s5 = sshll.u32 %s1148_s22, 1  ;;  %s268_s0 = scalar_lea.sflag [#allocation6], %s1148_s22 }
  0x2a   : > { %s1158_s23 = scalar_lea.vmem [#allocation5], %s689_s5 }
  0x2b   : > { %991 = dma.done.wait (%p1107_p8), %s268_s0, 32  }
  0x2c   : > { %993 = vsyncadd (%p1107_p8), %s268_s0, 4294967264  ;;  %s1164_s14 = scalar_lea.vmem [#allocation8], %s688_s12  ;;  %v1028_v0 = vmov 0.0   ;;  %s1170_s26 = scalar_lea.vmem [#allocation7], %s688_s12  ;;  %vm335_vm0 = vcmask 1041408  }
  0x2d   : > { %322 = vst [vmem:[%s1164_s14] sm:$0x3] %v1028_v0  ;;  %v330_v1 = vld [vmem:[%s261_s24] sm:$0x3]  ;;  %v331_v2 = vld [vmem:[%s261_s24 + $0x2] sm:$0x3]  ;;  %s1176_s27 = scalar_lea.vmem [#allocation10], %s688_s12 }
  0x2e   : > { %323 = vst [vmem:[%s1164_s14 + $0x2] sm:$0x3] %v1028_v0  ;;  %v332_v3 = vld [vmem:[%s261_s24 + $0x4] sm:$0x3]  ;;  %v333_v4 = vld [vmem:[%s261_s24 + $0x6] sm:$0x3] }
  0x2f   : > { %324 = vst [vmem:[%s1164_s14 + $0x4] sm:$0x3] %v1028_v0  ;;  %v336_v5 = vsel %vm335_vm0, %v330_v1, -inf  ;;  %v337_v6 = vsel %vm335_vm0, %v331_v2, -inf  ;;  %v338_v7 = vsel %vm335_vm0, %v332_v3, -inf  ;;  %v339_v8 = vsel %vm335_vm0, %v333_v4, -inf }
  0x30   : > { %325 = vst [vmem:[%s1164_s14 + $0x6] sm:$0x3] %v1028_v0  ;;  %v340_v9 = vmax.f32 %v336_v5, %v337_v6  ;;  %v341_v10 = vmax.f32 %v338_v7, %v339_v8  ;;  %v1187_v12 = vld [vmem:[%s1158_s23] sm:$0x3]  ;;  %s433_s7 = sand.u32 1, %s1087_s21   ;;  %s1219_s6 = sshll.u32 %s1016_s18, 3 }
  0x31   : > { %318 = vst [vmem:[%s1170_s26] sm:$0x3] %v1028_v0  ;;  %vm367_vm1 = vcmp.eq.s32.totalorder %v1187_v12, 0  ;;  %vm380_vm2 = vcmp.eq.s32.totalorder %v1187_v12, 1  ;;  %vm396_vm3 = vcmp.eq.s32.totalorder %v1187_v12, 2  ;;  %vm412_vm4 = vcmp.eq.s32.totalorder %v1187_v12, 3  ;;  %s471_s9 = scalar_lea.hbm %s1356_s3, %s1219_s6  ;;  %s472_s25 = sshll.u32 %s1164_s14, 4  ;;  %s1249_s25 = int_to_ptr.vmem [resolvable:$true] %s472_s25 }
  0x32   : > { %319 = vst [vmem:[%s1170_s26 + $0x2] sm:$0x3] %v1028_v0  ;;  %v342_v11 = vmax.f32 %v340_v9, %v341_v10  ;;  %v373_v22 = vsel %vm367_vm1, 1.0, %v1028_v0  ;;  %v388_v23 = vsel %vm380_vm2, 1.0, %v1028_v0  ;;  %v404_v28 = vsel %vm396_vm3, 1.0, %v1028_v0  ;;  %s452_s12 = scalar_lea.hbm %s1355_s2, %s1219_s6  ;;  %s490_s5 = scalar_lea.hbm %s1357_s4, %s1219_s6 }
  0x33   : > { %320 = vst [vmem:[%s1170_s26 + $0x4] sm:$0x3] %v1028_v0  ;;  %v420_v29 = vsel %vm412_vm4, 1.0, %v1028_v0  ;;  %s1251_s0 = sshll.u32 %s471_s9, 4  ;;  %s453_s23 = sshll.u32 %s1170_s26, 4  ;;  %s475_s0 = int_to_ptr.hbm [resolvable:$true] %s1251_s0  ;;  %s1264_s23 = int_to_ptr.vmem [resolvable:$true] %s453_s23 }
  0x34   : > { %321 = vst [vmem:[%s1170_s26 + $0x6] sm:$0x3] %v1028_v0  ;;  %v343_v13 = vsub.f32 %v330_v1, %v342_v11  ;;  %v344_v14 = vsub.f32 %v331_v2, %v342_v11  ;;  %v345_v15 = vsub.f32 %v332_v3, %v342_v11  ;;  %v346_v16 = vsub.f32 %v333_v4, %v342_v11  ;;  %v376_v49 = vld [vmem:[%s1164_s14] sm:$0x3]  ;;  %s1255_s18 = sshll.u32 %s452_s12, 4  ;;  %s1258_s8 = sshll.u32 %s490_s5, 4  ;;  %s456_s18 = int_to_ptr.hbm [resolvable:$true] %s1255_s18  ;;  %s494_s8 = int_to_ptr.hbm [resolvable:$true] %s1258_s8 }
  0x35   : > { %326 = vst [vmem:[%s1176_s27] sm:$0x3] %v1028_v0  ;;  %v697_v50 = vld [vmem:[%s1164_s14 + $0x2] sm:$0x3]  ;;  %s491_s6 = sshll.u32 %s1176_s27, 4  ;;  %s892_s9 = sshra.s32 %s475_s0, 4  ;;  %s1268_s6 = int_to_ptr.vmem [resolvable:$true] %s491_s6  ;;  %s893_s9 = int_to_ptr.hbm [resolvable:$true] %s892_s9 }
  0x36   : > { %327 = vst [vmem:[%s1176_s27 + $0x2] sm:$0x3] %v1028_v0  ;;  %v347_v17 = vmul.f32 1.442695, %v343_v13  ;;  %v349_v18 = vmul.f32 1.442695, %v344_v14  ;;  %p899_p7 = scmp.lt.s32.totalorder %s893_s9, %s1356_s3 }
  0x37   : > { %328 = vst [vmem:[%s1176_s27 + $0x4] sm:$0x3] %v1028_v0  ;;  %v351_v19 = vmul.f32 1.442695, %v345_v15  ;;  %v353_v20 = vmul.f32 1.442695, %v346_v16 }
  0x38   : > { %329 = vst [vmem:[%s1176_s27 + $0x6] sm:$0x3] %v1028_v0  ;;  %808 = vpow2.f32 %v347_v17  ;;  %v703_v51 = vld [vmem:[%s1164_s14 + $0x4] sm:$0x3]  ;;  %v709_v55 = vld [vmem:[%s1164_s14 + $0x6] sm:$0x3] }
  0x39   : > { %810 = vpow2.f32 %v349_v18  ;;  %v368_v57 = vld [vmem:[%s1170_s26] sm:$0x3]  ;;  %v693_v62 = vld [vmem:[%s1170_s26 + $0x2] sm:$0x3]  ;;  %s894_s10 = scalar_lea.hbm %s893_s9, 8  ;;  %s898_s12 = scalar_lea.hbm %s1356_s3, 16 }
  0x3a   : > { %812 = vpow2.f32 %v351_v19  ;;  %v699_v1 = vld [vmem:[%s1170_s26 + $0x4] sm:$0x3]  ;;  %p895_p4 = scmp.ne.s32.totalorder %s893_s9, %s894_s10  ;;  %p900_p8 = scmp.lt.s32.totalorder %s898_s12, %s894_s10 }
  0x3b   : > { %814 = vpow2.f32 %v353_v20  ;;  %v705_v4 = vld [vmem:[%s1170_s26 + $0x6] sm:$0x3] }
  0x3c   : > { %v372_v21 = vld [vmem:[%s1176_s27] sm:$0x3]  ;;  %p896_p5 = pnand %p895_p4, %p1111_p9  ;;  %p901_p10 = por %p900_p8, %p899_p7 }
  0x3d   : > { %v374_v24 = vadd.f32 %v373_v22, %v372_v21  ;;  %v695_v25 = vld [vmem:[%s1176_s27 + $0x2] sm:$0x3] }
  0x3e   : > { %v389_v26 = vadd.f32 %v695_v25, %v388_v23  ;;  %v701_v27 = vld [vmem:[%s1176_s27 + $0x4] sm:$0x3]  ;;  %v809_v33 = vpop.eup %808  ;;  %p897_p6 = pneg %p896_p5 }
  0x3f   : > { %375 = vst [vmem:[%s1176_s27] sm:$0x3] %v374_v24  ;;  %v405_v30 = vadd.f32 %v701_v27, %v404_v28  ;;  %v707_v31 = vld [vmem:[%s1176_s27 + $0x6] sm:$0x3]  ;;  %v811_v34 = vpop.eup %810  ;;  %v355_v35 = vsel %vm335_vm0, %v809_v33, 0.0 }
  0x40   : > { %696 = vst [vmem:[%s1176_s27 + $0x2] sm:$0x3] %v389_v26  ;;  %v421_v32 = vadd.f32 %v707_v31, %v420_v29  ;;  %v813_v36 = vpop.eup %812  ;;  %v356_v37 = vsel %vm335_vm0, %v811_v34, 0.0  ;;  %p902_p13 = pnand %p901_p10, %p897_p6 }
  0x41   : > { %702 = vst [vmem:[%s1176_s27 + $0x4] sm:$0x3] %v405_v30  ;;  %v815_v38 = vpop.eup %814  ;;  %v357_v39 = vadd.f32 %v356_v37, %v355_v35  ;;  %v358_v40 = vsel %vm335_vm0, %v813_v36, 0.0 }
  0x42   : > { %708 = vst [vmem:[%s1176_s27 + $0x6] sm:$0x3] %v421_v32  ;;  %v360_v41 = vsel %vm335_vm0, %v815_v38, 0.0 }
  0x43   : > { %v359_v42 = vadd.f32 %v358_v40, %v357_v39 }
  0x45   : > { %v361_v43 = vadd.f32 %v360_v41, %v359_v42 }
  0x47   : > { %816 = vrcp.f32 %v361_v43 }
  0x4d   : > { %v817_v44 = vpop.eup %816 }
  0x4e   : > { %v363_v45 = vmul.f32 %v817_v44, %v809_v33  ;;  %v364_v46 = vmul.f32 %v817_v44, %v811_v34  ;;  %v365_v47 = vmul.f32 %v817_v44, %v813_v36  ;;  %v366_v48 = vmul.f32 %v817_v44, %v815_v38 }
  0x50   : > { %v377_v52 = vmul.f32 %v363_v45, %v363_v45  ;;  %v393_v53 = vmul.f32 %v364_v46, %v364_v46  ;;  %v409_v54 = vmul.f32 %v365_v47, %v365_v47  ;;  %v425_v56 = vmul.f32 %v366_v48, %v366_v48 }
  0x51   : > { %v369_v58 = vsel %vm367_vm1, %v363_v45, 0.0  ;;  %v383_v63 = vsel %vm380_vm2, %v364_v46, 0.0  ;;  %v399_v2 = vsel %vm396_vm3, %v365_v47, 0.0  ;;  %v415_v5 = vsel %vm412_vm4, %v366_v48, 0.0 }
  0x52   : > { %v378_v59 = vadd.f32 %v377_v52, %v376_v49  ;;  %v394_v60 = vadd.f32 %v697_v50, %v393_v53  ;;  %v410_v61 = vadd.f32 %v703_v51, %v409_v54  ;;  %v426_v0 = vadd.f32 %v709_v55, %v425_v56 }
  0x53   : > { %v370_v3 = vadd.f32 %v369_v58, %v368_v57  ;;  %v384_v6 = vadd.f32 %v693_v62, %v383_v63  ;;  %v400_v7 = vadd.f32 %v699_v1, %v399_v2  ;;  %v416_v8 = vadd.f32 %v705_v4, %v415_v5 }
  0x54   : > { %379 = vst [vmem:[%s1164_s14] sm:$0x3] %v378_v59 }
  0x55   : > { %698 = vst [vmem:[%s1164_s14 + $0x2] sm:$0x3] %v394_v60 }
  0x56   : > { %704 = vst [vmem:[%s1164_s14 + $0x4] sm:$0x3] %v410_v61 }
  0x57   : > { %710 = vst [vmem:[%s1164_s14 + $0x6] sm:$0x3] %v426_v0  ;;  %s1273_s14 = scalar_lea.sflag [#allocation9], %s433_s7 }
  0x58   : > { %371 = vst [vmem:[%s1170_s26] sm:$0x3] %v370_v3 }
  0x59   : > { %694 = vst [vmem:[%s1170_s26 + $0x2] sm:$0x3] %v384_v6 }
  0x5a   : > { %700 = vst [vmem:[%s1170_s26 + $0x4] sm:$0x3] %v400_v7 }
  0x5b   : > { %706 = vst [vmem:[%s1170_s26 + $0x6] sm:$0x3] %v416_v8 }
  0x5c   : > { %905 = shalt.err (!%p902_p13)
}
  0x5d   : > { %s1029_s21 = smov 32   ;;  %s1030_s26 = smov 2  }
  0x5e   : > { %731 = dma.vmem_to_hbm [thread:$0]  (%p1111_p9), %s1249_s25, 128, %s475_s0, %s1273_s14, %s1029_s21, %s1029_s21, %s1030_s26  }
  0x5f   : > { %s429_s7 = scalar_lea.sflag [#allocation4], %s1148_s22  ;;  %s920_s5 = sshra.s32 %s456_s18, 4  ;;  %s921_s5 = int_to_ptr.hbm [resolvable:$true] %s920_s5 }
  0x60   : > { %s922_s9 = scalar_lea.hbm %s921_s5, 8  ;;  %s926_s11 = scalar_lea.hbm %s1355_s2, 16 }
  0x61   : > { %p923_p0 = scmp.ne.s32.totalorder %s921_s5, %s922_s9  ;;  %p927_p3 = scmp.lt.s32.totalorder %s921_s5, %s1355_s2 }
  0x62   : > { %p928_p4 = scmp.lt.s32.totalorder %s926_s11, %s922_s9 }
  0x63   : > { %p924_p1 = pnand %p923_p0, %p1111_p9 }
  0x64   : > { %p929_p5 = por %p928_p4, %p927_p3 }
  0x65   : > { %p925_p2 = pneg %p924_p1 }
  0x67   : > { %p930_p6 = pnand %p929_p5, %p925_p2 }
  0x69   : > { %933 = shalt.err (!%p930_p6)
}
  0x6a   : > { %730 = dma.vmem_to_hbm [thread:$0]  (%p1111_p9), %s1264_s23, 128, %s456_s18, %s429_s7, %s1029_s21, %s1029_s21, %s1030_s26  }
  0x6b   : > { %s948_s22 = sshra.s32 %s494_s8, 4  ;;  %s954_s5 = scalar_lea.hbm %s1357_s4, 16  ;;  %s949_s22 = int_to_ptr.hbm [resolvable:$true] %s948_s22 }
  0x6c   : > { %s950_s25 = scalar_lea.hbm %s949_s22, 8  ;;  %p955_p13 = scmp.lt.s32.totalorder %s949_s22, %s1357_s4 }
  0x6d   : > { %p951_p7 = scmp.ne.s32.totalorder %s949_s22, %s950_s25  ;;  %p956_p0 = scmp.lt.s32.totalorder %s954_s5, %s950_s25 }
  0x6f   : > { %p952_p8 = pnand %p951_p7, %p1111_p9  ;;  %p957_p1 = por %p956_p0, %p955_p13 }
  0x71   : > { %p953_p10 = pneg %p952_p8 }
  0x73   : > { %p958_p2 = pnand %p957_p1, %p953_p10 }
  0x75   : > { %961 = shalt.err (!%p958_p2)
}
  0x76   : > { %732 = dma.vmem_to_hbm [thread:$0]  (%p1111_p9), %s1268_s6, 128, %s494_s8, %s1273_s14, %s1029_s21, %s1029_s21, %s1030_s26  }
  0x77 PF: > { %s508_s23 = sand.u32 1, %s1004_s15   ;;  %p744_p3 = pnand %p681_p12, %p1120_p11 }
  0x78   : > { %s509_s18 = scalar_lea.sflag [#allocation4], %s508_s23 }
  0x79   : > { %p745_p4 = pneg %p744_p3 }
  0x7b   : > { %995 = dma.done.wait (%p745_p4), %s509_s18, 128  }
  0x7c   : > { %997 = vsyncadd (%p745_p4), %s509_s18, 4294967168  ;;  %s1368_s28 = sadd.s32 4294967294, %s1024_s20  }
  0x7d   : > { %s518_s7 = sand.u32 1, %s1368_s28  }
  0x7e   : > { %s519_s27 = scalar_lea.sflag [#allocation9], %s518_s7 }
  0x7f   : > { %999 = dma.done.wait (%p745_p4), %s519_s27, 256  }
  0x80   : > { %1001 = vsyncadd (%p745_p4), %s519_s27, 4294967040  ;;  %s27_s20 = sadd.s32 1, %s1024_s20   ;;  %s1369_s30 = sld [smem:[#allocation15_spill]] }
  0x81   : > { %p24_p9 = scmp.ge.s32.totalorder %s27_s20, 4   ;;  %s1370_s15 = smov %s1008_s16 }
  0x82   : > { %s1371_s16 = smov %s1012_s17  ;;  %s1372_s17 = smov %s1118_s29 }
  0x83   : > { %s1373_s18 = smov %s1020_s19  ;;  %26 = sbr.rel (!%p24_p9) target bundleno = 12 (0xc), region = 131 }
  0x86   : > { %s1374_s19 = smov %s1369_s30 }
  0x88   :  { %535 = vsyncpa [#allocation3], 1 }
  0x89   :  { %537 = vsyncpa [#allocation3 + $0x1], 1 }
  0x8a   :  { %538 = vsyncpa [#allocation6], 1 }
  0x8b   :  { %540 = vsyncpa [#allocation6 + $0x1], 1 }
  0x8c   :  { %541 = vsyncpa [#allocation4], 1 }
  0x8d   :  { %543 = vsyncpa [#allocation4 + $0x1], 1 }
  0x8e   :  { %544 = vsyncpa [#allocation9], 1 }
  0x8f   :  { %546 = vsyncpa [#allocation9 + $0x1], 1 }

</bundles_post_ra>
